<compile_context>
chip_gen: v5e
topology: v5e:2x2
jax: 0.10.0
libtpu: 0.0.40
codegen_flags: <defaults>
</compile_context>

<pallas_src>
import jax
import jax.numpy as jnp
from jax.experimental import pallas as pl
from jax.experimental.pallas import tpu as pltpu


# Static problem geometry of the wrapped CNN.
C_IN = 4                       # conv1 input channels
C_MID = 8                      # conv1 output / conv2 input channels
C_OUT = 16                     # conv2 output channels (the hooked layer)
H = 16
W = 16
HW = H * W                     # 256 lanes -> lane-dense layout
CP = 8                         # channels per tap group (sublane-tile aligned)
N_TAPS = 9                     # 3x3 kernel
K_DIM = N_TAPS * CP + CP       # 72 tap rows + 8-row bias group = 80


def _fused_feature_kernel(x_ref, w1_ref, w2_ref, o_ref, p_ref):
    """conv1(3x3, SAME)+bias+relu -> conv2(3x3, SAME)+bias for one batch element.

    x_ref : (1, CP, HW)     input, channels zero-padded 4->8, lane-dense
    w1_ref: (C_MID, K_DIM)  conv1 weight, tap-major im2col layout, bias folded in
    w2_ref: (C_OUT, K_DIM)  conv2 weight, same layout
    o_ref : (1, C_OUT, HW)  conv2 output (the hooked feature), lane-dense
    p_ref : (K_DIM, HW)     im2col patch scratch (VMEM), shared by both convs
    """
    # ---- hoisted constants: spatial boundary masks + bias ones-row (built once) ----
    pos = jax.lax.broadcasted_iota(jnp.int32, (CP, HW), 1)      # flat pixel index
    col = pos % W
    row_lo = pos >= W                    # valid when dh = -1 (need i >= 1)
    row_hi = pos < (H - 1) * W           # valid when dh = +1 (need i <= H-2)
    col_lo = col >= 1                    # valid when dw = -1
    col_hi = col <= W - 2                # valid when dw = +1
    masks = {}
    for dh in (-1, 0, 1):
        for dw in (-1, 0, 1):
            m = None
            if dh == -1:
                m = row_lo
            elif dh == 1:
                m = row_hi
            if dw == -1:
                m = col_lo if m is None else m & col_lo
            elif dw == 1:
                m = col_hi if m is None else m & col_hi
            masks[(dh, dw)] = m

    sub = jax.lax.broadcasted_iota(jnp.int32, (CP, HW), 0)
    bias_rows = (sub == 0).astype(jnp.float32)   # row 0 = ones -> multiplies bias column

    # Bias ones-group written once per invocation (rows 72..79 of the patch matrix).
    p_ref[pl.ds(N_TAPS * CP, CP), :] = bias_rows

    def build_patches(src):
        """Lane-space im2col: 9 rolls (XLU) + masks (VPU), aligned (8,256) stores."""
        for kh in range(3):
            for kw in range(3):
                dh, dw = kh - 1, kw - 1
                off = dh * W + dw
                v = src if off == 0 else pltpu.roll(src, shift=(-off) % HW, axis=1)
                m = masks[(dh, dw)]
                if m is not None:
                    v = jnp.where(m, v, 0.0)
                p_ref[pl.ds((kh * 3 + kw) * CP, CP), :] = v

    # ---- conv1 + bias + relu1 (intermediate stays in VMEM/vregs) ----
    build_patches(x_ref[0])                                      # (CP, HW) source
    h = jnp.dot(w1_ref[...], p_ref[...],
                preferred_element_type=jnp.float32)              # (C_MID, HW)
    h = jnp.maximum(h, 0.0)

    # ---- conv2 (the hooked layer); reuse the same patch scratch ----
    build_patches(h)                                             # C_MID == CP
    out = jnp.dot(w2_ref[...], p_ref[...],
                  preferred_element_type=jnp.float32)            # (C_OUT, HW)
    o_ref[...] = out.reshape(1, C_OUT, HW).astype(o_ref.dtype)


def init_params(key, n_classes=10):
    """Deterministic synthetic parameters mirroring the wrapped CNN (PyTorch OIHW)."""
    k1, k2, k3, k4, k5, k6 = jax.random.split(key, 6)

    def uniform_fanin(k, shape, fan_in):
        bound = 1.0 / jnp.sqrt(fan_in)
        return jax.random.uniform(k, shape, jnp.float32, -bound, bound)

    return {
        "conv1_w": uniform_fanin(k1, (C_MID, C_IN, 3, 3), C_IN * 9),
        "conv1_b": uniform_fanin(k2, (C_MID,), C_IN * 9),
        "conv2_w": uniform_fanin(k3, (C_OUT, C_MID, 3, 3), C_MID * 9),
        "conv2_b": uniform_fanin(k4, (C_OUT,), C_MID * 9),
        # fc exists in the wrapped model but is never executed: the forward hook on
        # "conv2" raises StopIteration before it runs.
        "fc_w": uniform_fanin(k5, (n_classes, C_OUT * H * W), C_OUT * H * W),
        "fc_b": uniform_fanin(k6, (n_classes,), C_OUT * H * W),
    }


def prepare_extractor_params(params):
    """One-time weight prep: OIHW -> tap-major (Cout, K_DIM) layout, bias folded in.

    Column index = (kh*3 + kw)*CP + ci (ci padded to CP with zeros); column
    N_TAPS*CP holds the bias (matches the ones row of the patch matrix); the
    remaining columns are zero.  Done once, not per forward.
    """
    def prep_conv(w_oihw, b):
        co, ci, kh, kw = w_oihw.shape
        wt = jnp.transpose(w_oihw, (0, 2, 3, 1))                      # (co, kh, kw, ci)
        wt = jnp.pad(wt, ((0, 0), (0, 0), (0, 0), (0, CP - ci)))      # ci -> CP
        w = jnp.zeros((co, K_DIM), jnp.float32)
        w = w.at[:, : N_TAPS * CP].set(wt.reshape(co, N_TAPS * CP))
        w = w.at[:, N_TAPS * CP].set(b)                               # bias column
        return w.astype(jnp.float32)

    return {
        "w1": prep_conv(params["conv1_w"], params["conv1_b"]),
        "w2": prep_conv(params["conv2_w"], params["conv2_b"]),
    }


def feature_extractor_forward(prepped, x_nchw):
    """Equivalent of FeatureExtractor(model, "conv2").forward(x).

    Runs the wrapped model only up to (and including) layer "conv2" and returns that
    layer's output; relu2 / fc are never evaluated (hook StopIteration).
    """
    n, c_in, h, w = x_nchw.shape
    assert (c_in, h, w) == (C_IN, H, W)

    # Metadata reshape to lane-dense (N, C, 256); tiny zero-pad of channels 4 -> 8 so
    # the kernel sees full (8, 256) sublane/lane-aligned tiles everywhere.
    x_flat = x_nchw.reshape(n, c_in, HW).astype(jnp.float32)
    x_pad = jnp.pad(x_flat, ((0, 0), (0, CP - c_in), (0, 0)))

    out_flat = pl.pallas_call(
        _fused_feature_kernel,
        out_shape=jax.ShapeDtypeStruct((n, C_OUT, HW), jnp.float32),
        grid=(n,),
        in_specs=[
            pl.BlockSpec((1, CP, HW), lambda i: (i, 0, 0)),        # x (lane-dense)
            pl.BlockSpec((C_MID, K_DIM), lambda i: (0, 0)),        # w1 (+bias col)
            pl.BlockSpec((C_OUT, K_DIM), lambda i: (0, 0)),        # w2 (+bias col)
        ],
        out_specs=pl.BlockSpec((1, C_OUT, HW), lambda i: (i, 0, 0)),
        scratch_shapes=[pltpu.VMEM((K_DIM, HW), jnp.float32)],     # shared patch matrix
        compiler_params=pltpu.CompilerParams(
            dimension_semantics=("parallel",)),                    # N=2 -> both v7x TCs
    )(x_pad, prepped["w1"], prepped["w2"])

    # Pure metadata reshape back to NCHW -- no transpose.
    return out_flat.reshape(n, C_OUT, H, W)


def _reference_forward(params, x_nchw):
    """Pure-JAX reference (lax.conv) for the correctness check."""
    def conv(x, w, b):
        y = jax.lax.conv_general_dilated(
            x, w, window_strides=(1, 1), padding="SAME",
            dimension_numbers=("NCHW", "OIHW", "NCHW"))
        return y + b[None, :, None, None]

    h = jnp.maximum(conv(x_nchw, params["conv1_w"], params["conv1_b"]), 0.0)
    return conv(h, params["conv2_w"], params["conv2_b"])


if __name__ == "__main__":
    key = jax.random.PRNGKey(0)
    kp, kx = jax.random.split(key)

    N = 2
    params = init_params(kp)
    prepped = prepare_extractor_params(params)        # weight prep done once
    x = jax.random.normal(kx, (N, C_IN, H, W), jnp.float32)

    fwd = jax.jit(feature_extractor_forward)
    feats = jax.block_until_ready(fwd(prepped, x))
    assert feats.shape == (N, C_OUT, H, W), feats.shape

    ref = jax.block_until_ready(_reference_forward(params, x))
    # Tolerance covers the bf16 rounding of the bias column inside the default-precision
    # MXU contraction (reference adds the bias in exact f32); real bugs are O(0.1+).
    assert jnp.allclose(feats, ref, atol=2e-3, rtol=2e-3), \
        float(jnp.max(jnp.abs(feats - ref)))

    print("KERNEL_OK")
</pallas_src>

<mosaic_0001>
module attributes {stable_mosaic.version = 11 : i64} {
  func.func @_fused_feature_kernel(%arg0: i32, %arg1: memref<1x8x256xf32, #tpu.memory_space<vmem>>, %arg2: memref<8x80xf32, #tpu.memory_space<vmem>>, %arg3: memref<16x80xf32, #tpu.memory_space<vmem>>, %arg4: memref<1x16x256xf32, #tpu.memory_space<vmem>>, %arg5: memref<80x256xf32, #tpu.memory_space<vmem>>) attributes {dimension_semantics = [#tpu.dimension_semantics<parallel>], iteration_bounds = array<i64: 2>, scalar_prefetch = 0 : i64, scratch_operands = 1 : i64, tpu.core_type = #tpu.core_type<tc>, window_params = [{transform_indices = @transform_0, window_bounds = array<i64: 1, 8, 256>}, {pipeline_mode = #tpu.pipeline_mode<synchronous>, transform_indices = @transform_1, window_bounds = array<i64: 8, 80>}, {pipeline_mode = #tpu.pipeline_mode<synchronous>, transform_indices = @transform_2, window_bounds = array<i64: 16, 80>}, {transform_indices = @transform_3, window_bounds = array<i64: 1, 16, 256>}]} {
    %0 = tpu.iota {dimensions = array<i32: 1>} : vector<8x256xi32>
    %c16_i32 = arith.constant 16 : i32
    %c0_i32 = arith.constant 0 : i32
    %1 = arith.cmpi eq, %c16_i32, %c0_i32 : i32
    %c1_i32 = arith.constant 1 : i32
    %2 = arith.select %1, %c1_i32, %c16_i32 : i32
    %3 = vector.broadcast %2 : i32 to vector<8x256xi32>
    %4 = arith.remsi %0, %3 : vector<8x256xi32>
    %c0_i32_0 = arith.constant 0 : i32
    %5 = vector.broadcast %c0_i32_0 : i32 to vector<8x256xi32>
    %6 = arith.cmpi ne, %4, %5 : vector<8x256xi32>
    %c0_i32_1 = arith.constant 0 : i32
    %7 = vector.broadcast %c0_i32_1 : i32 to vector<8x256xi32>
    %8 = arith.cmpi slt, %4, %7 : vector<8x256xi32>
    %c0_i32_2 = arith.constant 0 : i32
    %9 = arith.cmpi slt, %2, %c0_i32_2 : i32
    %10 = vector.broadcast %9 : i1 to vector<8x256xi1>
    %11 = vector.broadcast %10 : vector<8x256xi1> to vector<8x256xi1>
    %12 = arith.xori %8, %11 : vector<8x256xi1>
    %13 = arith.andi %12, %6 : vector<8x256xi1>
    %14 = vector.broadcast %2 : i32 to vector<8x256xi32>
    %15 = arith.addi %4, %14 : vector<8x256xi32>
    %16 = arith.select %13, %15, %4 : vector<8x256xi1>, vector<8x256xi32>
    %c16_i32_3 = arith.constant 16 : i32
    %17 = vector.broadcast %c16_i32_3 : i32 to vector<8x256xi32>
    %18 = arith.cmpi sge, %0, %17 : vector<8x256xi32>
    %c240_i32 = arith.constant 240 : i32
    %19 = vector.broadcast %c240_i32 : i32 to vector<8x256xi32>
    %20 = arith.cmpi slt, %0, %19 : vector<8x256xi32>
    %c1_i32_4 = arith.constant 1 : i32
    %21 = vector.broadcast %c1_i32_4 : i32 to vector<8x256xi32>
    %22 = arith.cmpi sge, %16, %21 : vector<8x256xi32>
    %c14_i32 = arith.constant 14 : i32
    %23 = vector.broadcast %c14_i32 : i32 to vector<8x256xi32>
    %24 = arith.cmpi sle, %16, %23 : vector<8x256xi32>
    %25 = arith.andi %18, %22 : vector<8x256xi1>
    %26 = arith.andi %18, %24 : vector<8x256xi1>
    %27 = arith.andi %20, %22 : vector<8x256xi1>
    %28 = arith.andi %20, %24 : vector<8x256xi1>
    %29 = tpu.iota {dimensions = array<i32: 0>} : vector<8x256xi32>
    %c0_i32_5 = arith.constant 0 : i32
    %30 = vector.broadcast %c0_i32_5 : i32 to vector<8x256xi32>
    %31 = arith.cmpi eq, %29, %30 : vector<8x256xi32>
    %32 = arith.extui %31 : vector<8x256xi1> to vector<8x256xi32>
    %33 = arith.sitofp %32 : vector<8x256xi32> to vector<8x256xf32>
    %c72 = arith.constant 72 : index
    %c0 = arith.constant 0 : index
    %34 = vector.load %arg5[%c72, %c0] : memref<80x256xf32, #tpu.memory_space<vmem>>, vector<8x256xf32>
    tpu.vector_store %arg5[%c72, %c0], %33 {strides = array<i32>} : memref<80x256xf32, #tpu.memory_space<vmem>>, vector<8x256xf32>,
    %c0_6 = arith.constant 0 : index
    %c0_7 = arith.constant 0 : index
    %c0_8 = arith.constant 0 : index
    %35 = vector.load %arg1[%c0_6, %c0_7, %c0_8] : memref<1x8x256xf32, #tpu.memory_space<vmem>>, vector<1x8x256xf32>
    %36 = vector.shape_cast %35 : vector<1x8x256xf32> to vector<8x256xf32>
    %c17_i32 = arith.constant 17 : i32
    %37 = tpu.dynamic_rotate %36 by %c17_i32 dim 1 : vector<8x256xf32>, i32 -> vector<8x256xf32>
    %cst = arith.constant 0.000000e+00 : f32
    %38 = vector.broadcast %cst : f32 to vector<8x256xf32>
    %39 = arith.select %25, %37, %38 : vector<8x256xi1>, vector<8x256xf32>
    %c0_9 = arith.constant 0 : index
    %c0_10 = arith.constant 0 : index
    %40 = vector.load %arg5[%c0_9, %c0_10] : memref<80x256xf32, #tpu.memory_space<vmem>>, vector<8x256xf32>
    tpu.vector_store %arg5[%c0_9, %c0_10], %39 {strides = array<i32>} : memref<80x256xf32, #tpu.memory_space<vmem>>, vector<8x256xf32>,
    %c16_i32_11 = arith.constant 16 : i32
    %41 = tpu.dynamic_rotate %36 by %c16_i32_11 dim 1 : vector<8x256xf32>, i32 -> vector<8x256xf32>
    %cst_12 = arith.constant 0.000000e+00 : f32
    %42 = vector.broadcast %cst_12 : f32 to vector<8x256xf32>
    %43 = arith.select %18, %41, %42 : vector<8x256xi1>, vector<8x256xf32>
    %c8 = arith.constant 8 : index
    %c0_13 = arith.constant 0 : index
    %44 = vector.load %arg5[%c8, %c0_13] : memref<80x256xf32, #tpu.memory_space<vmem>>, vector<8x256xf32>
    tpu.vector_store %arg5[%c8, %c0_13], %43 {strides = array<i32>} : memref<80x256xf32, #tpu.memory_space<vmem>>, vector<8x256xf32>,
    %c15_i32 = arith.constant 15 : i32
    %45 = tpu.dynamic_rotate %36 by %c15_i32 dim 1 : vector<8x256xf32>, i32 -> vector<8x256xf32>
    %cst_14 = arith.constant 0.000000e+00 : f32
    %46 = vector.broadcast %cst_14 : f32 to vector<8x256xf32>
    %47 = arith.select %26, %45, %46 : vector<8x256xi1>, vector<8x256xf32>
    %c16 = arith.constant 16 : index
    %c0_15 = arith.constant 0 : index
    %48 = vector.load %arg5[%c16, %c0_15] : memref<80x256xf32, #tpu.memory_space<vmem>>, vector<8x256xf32>
    tpu.vector_store %arg5[%c16, %c0_15], %47 {strides = array<i32>} : memref<80x256xf32, #tpu.memory_space<vmem>>, vector<8x256xf32>,
    %c1_i32_16 = arith.constant 1 : i32
    %49 = tpu.dynamic_rotate %36 by %c1_i32_16 dim 1 : vector<8x256xf32>, i32 -> vector<8x256xf32>
    %cst_17 = arith.constant 0.000000e+00 : f32
    %50 = vector.broadcast %cst_17 : f32 to vector<8x256xf32>
    %51 = arith.select %22, %49, %50 : vector<8x256xi1>, vector<8x256xf32>
    %c24 = arith.constant 24 : index
    %c0_18 = arith.constant 0 : index
    %52 = vector.load %arg5[%c24, %c0_18] : memref<80x256xf32, #tpu.memory_space<vmem>>, vector<8x256xf32>
    tpu.vector_store %arg5[%c24, %c0_18], %51 {strides = array<i32>} : memref<80x256xf32, #tpu.memory_space<vmem>>, vector<8x256xf32>,
    %c32 = arith.constant 32 : index
    %c0_19 = arith.constant 0 : index
    %53 = vector.load %arg5[%c32, %c0_19] : memref<80x256xf32, #tpu.memory_space<vmem>>, vector<8x256xf32>
    tpu.vector_store %arg5[%c32, %c0_19], %36 {strides = array<i32>} : memref<80x256xf32, #tpu.memory_space<vmem>>, vector<8x256xf32>,
    %c255_i32 = arith.constant 255 : i32
    %54 = tpu.dynamic_rotate %36 by %c255_i32 dim 1 : vector<8x256xf32>, i32 -> vector<8x256xf32>
    %cst_20 = arith.constant 0.000000e+00 : f32
    %55 = vector.broadcast %cst_20 : f32 to vector<8x256xf32>
    %56 = arith.select %24, %54, %55 : vector<8x256xi1>, vector<8x256xf32>
    %c40 = arith.constant 40 : index
    %c0_21 = arith.constant 0 : index
    %57 = vector.load %arg5[%c40, %c0_21] : memref<80x256xf32, #tpu.memory_space<vmem>>, vector<8x256xf32>
    tpu.vector_store %arg5[%c40, %c0_21], %56 {strides = array<i32>} : memref<80x256xf32, #tpu.memory_space<vmem>>, vector<8x256xf32>,
    %c241_i32 = arith.constant 241 : i32
    %58 = tpu.dynamic_rotate %36 by %c241_i32 dim 1 : vector<8x256xf32>, i32 -> vector<8x256xf32>
    %cst_22 = arith.constant 0.000000e+00 : f32
    %59 = vector.broadcast %cst_22 : f32 to vector<8x256xf32>
    %60 = arith.select %27, %58, %59 : vector<8x256xi1>, vector<8x256xf32>
    %c48 = arith.constant 48 : index
    %c0_23 = arith.constant 0 : index
    %61 = vector.load %arg5[%c48, %c0_23] : memref<80x256xf32, #tpu.memory_space<vmem>>, vector<8x256xf32>
    tpu.vector_store %arg5[%c48, %c0_23], %60 {strides = array<i32>} : memref<80x256xf32, #tpu.memory_space<vmem>>, vector<8x256xf32>,
    %c240_i32_24 = arith.constant 240 : i32
    %62 = tpu.dynamic_rotate %36 by %c240_i32_24 dim 1 : vector<8x256xf32>, i32 -> vector<8x256xf32>
    %cst_25 = arith.constant 0.000000e+00 : f32
    %63 = vector.broadcast %cst_25 : f32 to vector<8x256xf32>
    %64 = arith.select %20, %62, %63 : vector<8x256xi1>, vector<8x256xf32>
    %c56 = arith.constant 56 : index
    %c0_26 = arith.constant 0 : index
    %65 = vector.load %arg5[%c56, %c0_26] : memref<80x256xf32, #tpu.memory_space<vmem>>, vector<8x256xf32>
    tpu.vector_store %arg5[%c56, %c0_26], %64 {strides = array<i32>} : memref<80x256xf32, #tpu.memory_space<vmem>>, vector<8x256xf32>,
    %c239_i32 = arith.constant 239 : i32
    %66 = tpu.dynamic_rotate %36 by %c239_i32 dim 1 : vector<8x256xf32>, i32 -> vector<8x256xf32>
    %cst_27 = arith.constant 0.000000e+00 : f32
    %67 = vector.broadcast %cst_27 : f32 to vector<8x256xf32>
    %68 = arith.select %28, %66, %67 : vector<8x256xi1>, vector<8x256xf32>
    %c64 = arith.constant 64 : index
    %c0_28 = arith.constant 0 : index
    %69 = vector.load %arg5[%c64, %c0_28] : memref<80x256xf32, #tpu.memory_space<vmem>>, vector<8x256xf32>
    tpu.vector_store %arg5[%c64, %c0_28], %68 {strides = array<i32>} : memref<80x256xf32, #tpu.memory_space<vmem>>, vector<8x256xf32>,
    %c0_29 = arith.constant 0 : index
    %c0_30 = arith.constant 0 : index
    %70 = vector.load %arg2[%c0_29, %c0_30] : memref<8x80xf32, #tpu.memory_space<vmem>>, vector<8x80xf32>
    %c0_31 = arith.constant 0 : index
    %c0_32 = arith.constant 0 : index
    %71 = vector.load %arg5[%c0_31, %c0_32] : memref<80x256xf32, #tpu.memory_space<vmem>>, vector<80x256xf32>
    %cst_33 = arith.constant dense<0.000000e+00> : vector<8x256xf32>
    %72 = tpu.matmul %70, %71, %cst_33 {dimension_numbers = #tpu.dot_dimension_numbers<[1], [0], [0], [1], [0, 0, 1, 1], [], []>} : vector<8x80xf32>, vector<80x256xf32>, vector<8x256xf32> -> vector<8x256xf32>
    %cst_34 = arith.constant 0.000000e+00 : f32
    %73 = vector.broadcast %cst_34 : f32 to vector<8x256xf32>
    %74 = arith.maximumf %72, %73 : vector<8x256xf32>
    %c17_i32_35 = arith.constant 17 : i32
    %75 = tpu.dynamic_rotate %74 by %c17_i32_35 dim 1 : vector<8x256xf32>, i32 -> vector<8x256xf32>
    %cst_36 = arith.constant 0.000000e+00 : f32
    %76 = vector.broadcast %cst_36 : f32 to vector<8x256xf32>
    %77 = arith.select %25, %75, %76 : vector<8x256xi1>, vector<8x256xf32>
    %c0_37 = arith.constant 0 : index
    %c0_38 = arith.constant 0 : index
    %78 = vector.load %arg5[%c0_37, %c0_38] : memref<80x256xf32, #tpu.memory_space<vmem>>, vector<8x256xf32>
    tpu.vector_store %arg5[%c0_37, %c0_38], %77 {strides = array<i32>} : memref<80x256xf32, #tpu.memory_space<vmem>>, vector<8x256xf32>,
    %c16_i32_39 = arith.constant 16 : i32
    %79 = tpu.dynamic_rotate %74 by %c16_i32_39 dim 1 : vector<8x256xf32>, i32 -> vector<8x256xf32>
    %cst_40 = arith.constant 0.000000e+00 : f32
    %80 = vector.broadcast %cst_40 : f32 to vector<8x256xf32>
    %81 = arith.select %18, %79, %80 : vector<8x256xi1>, vector<8x256xf32>
    %c8_41 = arith.constant 8 : index
    %c0_42 = arith.constant 0 : index
    %82 = vector.load %arg5[%c8_41, %c0_42] : memref<80x256xf32, #tpu.memory_space<vmem>>, vector<8x256xf32>
    tpu.vector_store %arg5[%c8_41, %c0_42], %81 {strides = array<i32>} : memref<80x256xf32, #tpu.memory_space<vmem>>, vector<8x256xf32>,
    %c15_i32_43 = arith.constant 15 : i32
    %83 = tpu.dynamic_rotate %74 by %c15_i32_43 dim 1 : vector<8x256xf32>, i32 -> vector<8x256xf32>
    %cst_44 = arith.constant 0.000000e+00 : f32
    %84 = vector.broadcast %cst_44 : f32 to vector<8x256xf32>
    %85 = arith.select %26, %83, %84 : vector<8x256xi1>, vector<8x256xf32>
    %c16_45 = arith.constant 16 : index
    %c0_46 = arith.constant 0 : index
    %86 = vector.load %arg5[%c16_45, %c0_46] : memref<80x256xf32, #tpu.memory_space<vmem>>, vector<8x256xf32>
    tpu.vector_store %arg5[%c16_45, %c0_46], %85 {strides = array<i32>} : memref<80x256xf32, #tpu.memory_space<vmem>>, vector<8x256xf32>,
    %c1_i32_47 = arith.constant 1 : i32
    %87 = tpu.dynamic_rotate %74 by %c1_i32_47 dim 1 : vector<8x256xf32>, i32 -> vector<8x256xf32>
    %cst_48 = arith.constant 0.000000e+00 : f32
    %88 = vector.broadcast %cst_48 : f32 to vector<8x256xf32>
    %89 = arith.select %22, %87, %88 : vector<8x256xi1>, vector<8x256xf32>
    %c24_49 = arith.constant 24 : index
    %c0_50 = arith.constant 0 : index
    %90 = vector.load %arg5[%c24_49, %c0_50] : memref<80x256xf32, #tpu.memory_space<vmem>>, vector<8x256xf32>
    tpu.vector_store %arg5[%c24_49, %c0_50], %89 {strides = array<i32>} : memref<80x256xf32, #tpu.memory_space<vmem>>, vector<8x256xf32>,
    %c32_51 = arith.constant 32 : index
    %c0_52 = arith.constant 0 : index
    %91 = vector.load %arg5[%c32_51, %c0_52] : memref<80x256xf32, #tpu.memory_space<vmem>>, vector<8x256xf32>
    tpu.vector_store %arg5[%c32_51, %c0_52], %74 {strides = array<i32>} : memref<80x256xf32, #tpu.memory_space<vmem>>, vector<8x256xf32>,
    %c255_i32_53 = arith.constant 255 : i32
    %92 = tpu.dynamic_rotate %74 by %c255_i32_53 dim 1 : vector<8x256xf32>, i32 -> vector<8x256xf32>
    %cst_54 = arith.constant 0.000000e+00 : f32
    %93 = vector.broadcast %cst_54 : f32 to vector<8x256xf32>
    %94 = arith.select %24, %92, %93 : vector<8x256xi1>, vector<8x256xf32>
    %c40_55 = arith.constant 40 : index
    %c0_56 = arith.constant 0 : index
    %95 = vector.load %arg5[%c40_55, %c0_56] : memref<80x256xf32, #tpu.memory_space<vmem>>, vector<8x256xf32>
    tpu.vector_store %arg5[%c40_55, %c0_56], %94 {strides = array<i32>} : memref<80x256xf32, #tpu.memory_space<vmem>>, vector<8x256xf32>,
    %c241_i32_57 = arith.constant 241 : i32
    %96 = tpu.dynamic_rotate %74 by %c241_i32_57 dim 1 : vector<8x256xf32>, i32 -> vector<8x256xf32>
    %cst_58 = arith.constant 0.000000e+00 : f32
    %97 = vector.broadcast %cst_58 : f32 to vector<8x256xf32>
    %98 = arith.select %27, %96, %97 : vector<8x256xi1>, vector<8x256xf32>
    %c48_59 = arith.constant 48 : index
    %c0_60 = arith.constant 0 : index
    %99 = vector.load %arg5[%c48_59, %c0_60] : memref<80x256xf32, #tpu.memory_space<vmem>>, vector<8x256xf32>
    tpu.vector_store %arg5[%c48_59, %c0_60], %98 {strides = array<i32>} : memref<80x256xf32, #tpu.memory_space<vmem>>, vector<8x256xf32>,
    %c240_i32_61 = arith.constant 240 : i32
    %100 = tpu.dynamic_rotate %74 by %c240_i32_61 dim 1 : vector<8x256xf32>, i32 -> vector<8x256xf32>
    %cst_62 = arith.constant 0.000000e+00 : f32
    %101 = vector.broadcast %cst_62 : f32 to vector<8x256xf32>
    %102 = arith.select %20, %100, %101 : vector<8x256xi1>, vector<8x256xf32>
    %c56_63 = arith.constant 56 : index
    %c0_64 = arith.constant 0 : index
    %103 = vector.load %arg5[%c56_63, %c0_64] : memref<80x256xf32, #tpu.memory_space<vmem>>, vector<8x256xf32>
    tpu.vector_store %arg5[%c56_63, %c0_64], %102 {strides = array<i32>} : memref<80x256xf32, #tpu.memory_space<vmem>>, vector<8x256xf32>,
    %c239_i32_65 = arith.constant 239 : i32
    %104 = tpu.dynamic_rotate %74 by %c239_i32_65 dim 1 : vector<8x256xf32>, i32 -> vector<8x256xf32>
    %cst_66 = arith.constant 0.000000e+00 : f32
    %105 = vector.broadcast %cst_66 : f32 to vector<8x256xf32>
    %106 = arith.select %28, %104, %105 : vector<8x256xi1>, vector<8x256xf32>
    %c64_67 = arith.constant 64 : index
    %c0_68 = arith.constant 0 : index
    %107 = vector.load %arg5[%c64_67, %c0_68] : memref<80x256xf32, #tpu.memory_space<vmem>>, vector<8x256xf32>
    tpu.vector_store %arg5[%c64_67, %c0_68], %106 {strides = array<i32>} : memref<80x256xf32, #tpu.memory_space<vmem>>, vector<8x256xf32>,
    %c0_69 = arith.constant 0 : index
    %c0_70 = arith.constant 0 : index
    %108 = vector.load %arg3[%c0_69, %c0_70] : memref<16x80xf32, #tpu.memory_space<vmem>>, vector<16x80xf32>
    %c0_71 = arith.constant 0 : index
    %c0_72 = arith.constant 0 : index
    %109 = vector.load %arg5[%c0_71, %c0_72] : memref<80x256xf32, #tpu.memory_space<vmem>>, vector<80x256xf32>
    %cst_73 = arith.constant dense<0.000000e+00> : vector<16x256xf32>
    %110 = tpu.matmul %108, %109, %cst_73 {dimension_numbers = #tpu.dot_dimension_numbers<[1], [0], [0], [1], [0, 0, 1, 1], [], []>} : vector<16x80xf32>, vector<80x256xf32>, vector<16x256xf32> -> vector<16x256xf32>
    %111 = vector.shape_cast %110 : vector<16x256xf32> to vector<1x16x256xf32>
    %c0_74 = arith.constant 0 : index
    %c0_75 = arith.constant 0 : index
    %c0_76 = arith.constant 0 : index
    %112 = vector.load %arg4[%c0_74, %c0_75, %c0_76] : memref<1x16x256xf32, #tpu.memory_space<vmem>>, vector<1x16x256xf32>
    tpu.vector_store %arg4[%c0_74, %c0_75, %c0_76], %111 {strides = array<i32>} : memref<1x16x256xf32, #tpu.memory_space<vmem>>, vector<1x16x256xf32>,
    return
  }
  func.func @transform_0(%arg0: i32) -> (i32, i32, i32) {
    %c0_i32 = arith.constant 0 : i32
    %c0_i32_0 = arith.constant 0 : i32
    %c0_i32_1 = arith.constant 0 : i32
    return %arg0, %c0_i32, %c0_i32_0 : i32, i32, i32
  }
  func.func @transform_1(%arg0: i32) -> (i32, i32) {
    %c0_i32 = arith.constant 0 : i32
    %c0_i32_0 = arith.constant 0 : i32
    %c0_i32_1 = arith.constant 0 : i32
    return %c0_i32, %c0_i32_0 : i32, i32
  }
  func.func @transform_2(%arg0: i32) -> (i32, i32) {
    %c0_i32 = arith.constant 0 : i32
    %c0_i32_0 = arith.constant 0 : i32
    %c0_i32_1 = arith.constant 0 : i32
    return %c0_i32, %c0_i32_0 : i32, i32
  }
  func.func @transform_3(%arg0: i32) -> (i32, i32, i32) {
    %c0_i32 = arith.constant 0 : i32
    %c0_i32_0 = arith.constant 0 : i32
    %c0_i32_1 = arith.constant 0 : i32
    return %arg0, %c0_i32, %c0_i32_0 : i32, i32, i32
  }
}

</mosaic_0001>

<bundles_post_ra>
// kernel: feature_extractor_forward.1
= control target key start
LH: loop header
LB: loop body
LE: loop exit
PB: predicated region body
PF: predicated region fallthrough
CT: control target
= control target key end

     0   :  { %s701_s12 = smov 0   ;;  %s976_s0 = inlined_call_operand.vmem [shape: f32[2,8,256], index: 0, kind: input, shape index: {}]   ;;  %s977_s1 = inlined_call_operand.vmem [shape: f32[8,80], index: 1, kind: input, shape index: {}]   ;;  %s978_s2 = inlined_call_operand.vmem [shape: f32[16,80], index: 2, kind: input, shape index: {}]   ;;  %s979_s3 = inlined_call_operand.vmem [shape: f32[2,16,256], index: 3, kind: output, shape index: {}]  }
   0x1 LB: > { %s595_s13 = sadd.s32 4294967295, %s670_s12   ;;  %p599_p0 = scmp.ge.s32.totalorder %s670_s12, 1  ;;  %s670_s12 = sphi %s701_s12, %s13_s12  }
   0x2   : > { %p137_p1 = scmp.lt.s32.totalorder %s670_s12, 3 }
   0x4   : > { %p138_p2 = pnand %p599_p0, %p137_p1 }
   0x5   : > { %p161_p3 = scmp.lt.s32.totalorder (!%p138_p2), %s595_s13, 1  ;;  %s672_s18 = smov (!%p138_p2), 112  }
   0x6   : > { %141 = sbr.rel (%p138_p2) target bundleno = 599 (0x257), region = 32  ;;  %s673_s19 = smov (!%p138_p2), 111  }
   0x7   : > { %s674_s20 = smov (!%p138_p2), 113   ;;  %s675_s21 = smov (!%p138_p2), 127  }
   0x8   : > { %s676_s22 = smov (!%p138_p2), 1   ;;  %s677_s23 = smov (!%p138_p2), 15  }
   0x9   : > { %s678_s24 = smov (!%p138_p2), 16   ;;  %s679_s25 = smov (!%p138_p2), 17  }
   0xb   : > { %s1006_s13 = smov (!%p161_p3, %s595_s13), 1  ;;  %v171_v2 = vlaneseq  ;;  %v680_v4 = vmov 1.0   ;;  %v313_v47 = vld [vmem:[%s977_s1] sm:$0xff] }
   0xc   : > { %s613_s14 = sshll.u32 %s1006_s13, 4  ;;  %v462_v13 = vld [vmem:[%s978_s2] sm:$0xff]  ;;  %s614_s5 = sshll.u32 %s1006_s13, 5 }
   0xd   : > { %s165_s17 = scalar_lea.vmem %s976_s0, %s613_s14  ;;  %v215_v3 = vshrl.u32 %v171_v2, 7  ;;  %v751_v5 = vand.u32 127, %v171_v2  ;;  %s170_s8 = scalar_lea.vmem %s979_s3, %s614_s5 }
   0xe   : > { %v715_v0 = vld [vmem:[%s165_s17] sm:$0xff]  ;;  %v723_v1 = vld [vmem:[%s165_s17 + $0x8] sm:$0xff] }
   0xf   : > { %291 = vrot.lane.b32.xlu1 %v715_v0, %s672_s18  ;;  %302 = vrot.lane.b32.xlu0 %v715_v0, %s673_s19  ;;  %vm216_vm0 = vcmp.eq.s32.totalorder %v215_v3, 0  ;;  %v754_v7 = vadd.s32 128, %v751_v5  ;;  %v178_v11 = vand.u32 15, %v751_v5  ;;  %vm306_vm3 = vcmp.lt.s32.totalorder %v751_v5, 111 }
  0x10   : > { %280 = vrot.lane.b32.xlu2 %v715_v0, %s674_s20  ;;  %615 = vmatpush.msk.msra.mxu0 %vm216_vm0, %v680_v4  ;;  %vm295_vm6 = vcmp.lt.s32.totalorder %v751_v5, 112  ;;  %vm284_vm8 = vcmp.lt.s32.totalorder %v751_v5, 113  ;;  %vm273_vm11 = vcmp.lt.s32.totalorder %v751_v5, 127  ;;  %vm981_vm12 = vcmp.lt.s32.totalorder %v751_v5, 1 }
  0x11   : > { %623 = vmatpush.msk.msra.mxu1 %vm216_vm0, %v680_v4  ;;  %631 = vmatpush.msk.msra.mxu2 %vm216_vm0, %v680_v4  ;;  %v185_v10 = vand.u32 15, %v754_v7  ;;  %vm201_vm1 = vcmp.lt.s32.totalorder %v754_v7, 240  ;;  %vm764_vm4 = vcmp.le.s32.totalorder %v178_v11, 14  ;;  %vm794_vm9 = vcmp.ge.s32.totalorder %v178_v11, 1 }
  0x12   : > { %639 = vmatpush.msk.msra.mxu3 %vm216_vm0, %v680_v4  ;;  %vm198_vm13 = vcmp.ge.s32.totalorder %v751_v5, 16  ;;  %vm980_vm14 = vcmp.lt.s32.totalorder %v751_v5, 15  ;;  %vm982_vm0 = vcmp.lt.s32.totalorder %v751_v5, 16 }
  0x13   : > { %vm759_vm2 = vcmp.le.s32.totalorder %v185_v10, 14  ;;  %vm777_vm7 = vcmp.ge.s32.totalorder %v185_v10, 1  ;;  %vm838_vm15 = vmand %vm198_vm13, %vm764_vm4 }
  0x14   : > { %vm772_vm5 = vmand %vm201_vm1, %vm759_vm2 }
  0x15   : > { %vm802_vm10 = vmand %vm201_vm1, %vm777_vm7 }
  0x17   : > { %293 = vrot.lane.b32.xlu1 %v723_v1, %s672_s18  ;;  %304 = vrot.lane.b32.xlu0 %v723_v1, %s673_s19 }
  0x18   : > { %282 = vrot.lane.b32.xlu2 %v723_v1, %s674_s20 }
  0x1f   : > { %271 = vrot.lane.b32.xlu1 %v723_v1, %s675_s21  ;;  %269 = vrot.lane.b32.xlu0 %v715_v0, %s675_s21 }
  0x20   : > { %256 = vrot.lane.b32.xlu2 %v715_v0, %s676_s22 }
  0x27   : > { %245 = vrot.lane.b32.xlu1 %v715_v0, %s677_s23  ;;  %258 = vrot.lane.b32.xlu0 %v723_v1, %s676_s22 }
  0x28   : > { %247 = vrot.lane.b32.xlu2 %v723_v1, %s677_s23 }
  0x2f   : > { %236 = vrot.lane.b32.xlu1 %v723_v1, %s678_s24  ;;  %234 = vrot.lane.b32.xlu0 %v715_v0, %s678_s24 }
  0x30   : > { %223 = vrot.lane.b32.xlu2 %v715_v0, %s679_s25 }
  0x37   : > { %225 = vrot.lane.b32.xlu0 %v723_v1, %s679_s25 }
  0x6a   : > { %v281_v6 = vpop.permute.xlu2 %280 }
  0x72   : > { %v283_v12 = vpop.permute.xlu2 %282 }
  0x73   : > { %v285_v26 = vsel %vm284_vm8, %v281_v6, %v283_v12  ;;  %v286_v27 = vsel %vm284_vm8, %v283_v12, %v281_v6 }
  0x7a   : > { %v257_v25 = vpop.permute.xlu2 %256 }
  0x81   : > { %v292_v8 = vpop.permute.xlu1 %291  ;;  %v303_v9 = vpop.permute.xlu0 %302 }
  0x82   : > { %v248_v32 = vpop.permute.xlu2 %247 }
  0x89   : > { %v294_v16 = vpop.permute.xlu1 %293  ;;  %v305_v17 = vpop.permute.xlu0 %304 }
  0x8a   : > { %v307_v19 = vsel %vm306_vm3, %v303_v9, %v305_v17  ;;  %v308_v20 = vsel %vm306_vm3, %v305_v17, %v303_v9  ;;  %v296_v21 = vsel %vm295_vm6, %v292_v8, %v294_v16  ;;  %v297_v22 = vsel %vm295_vm6, %v294_v16, %v292_v8  ;;  %v224_v44 = vpop.permute.xlu2 %223 }
  0x8b   : > { %616 = vmatpush.msk.msra.mxu0 %vm764_vm4, %v307_v19  ;;  %624 = vmatpush.msk.msra.mxu1 %vm772_vm5, %v308_v20 }
  0x8d   : > { %346 = vmatpush.msra.mxu0 %v296_v21  ;;  %625 = vmatpush.msk.msra.mxu1 %vm201_vm1, %v297_v22 }
  0x8f   : > { %617 = vmatpush.msk.msra.mxu0 %vm794_vm9, %v285_v26  ;;  %626 = vmatpush.msk.msra.mxu1 %vm802_vm10, %v286_v27 }
  0x91   : > { %v272_v28 = vpop.permute.xlu1 %271  ;;  %v270_v29 = vpop.permute.xlu0 %269 }
  0x92   : > { %v274_v30 = vsel %vm273_vm11, %v270_v29, %v272_v28  ;;  %v275_v31 = vsel %vm273_vm11, %v272_v28, %v270_v29 }
  0x93   : > { %618 = vmatpush.msk.msra.mxu0 %vm764_vm4, %v274_v30  ;;  %627 = vmatpush.msk.msra.mxu1 %vm759_vm2, %v275_v31 }
  0x95   : > { %349 = vmatpush.msra.mxu0 %v715_v0  ;;  %369 = vmatpush.msra.mxu1 %v723_v1 }
  0x99   : > { %v246_v33 = vpop.permute.xlu1 %245  ;;  %v259_v34 = vpop.permute.xlu0 %258 }
  0x9a   : > { %v262_v35 = vsel %vm981_vm12, %v259_v34, %v257_v25  ;;  %v261_v36 = vsel %vm981_vm12, %v257_v25, %v259_v34  ;;  %v251_v38 = vsel %vm980_vm14, %v248_v32, %v246_v33  ;;  %v250_v39 = vsel %vm980_vm14, %v246_v33, %v248_v32  ;;  %vm866_vm12 = vmand %vm198_vm13, %vm794_vm9  ;;  %v463_v25 = vld [vmem:[%s978_s2 + $0x8] sm:$0xff] }
  0x9b   : > { %619 = vmatpush.msk.msra.mxu0 %vm794_vm9, %v262_v35  ;;  %628 = vmatpush.msk.msra.mxu1 %vm777_vm7, %v261_v36  ;;  %vm227_vm14 = vcmp.lt.s32.totalorder %v751_v5, 17 }
  0x9d   : > { %620 = vmatpush.msk.msra.mxu0 %vm838_vm15, %v251_v38  ;;  %629 = vmatpush.msk.msra.mxu1 %vm759_vm2, %v250_v39 }
  0xa1   : > { %v237_v40 = vpop.permute.xlu1 %236  ;;  %v235_v41 = vpop.permute.xlu0 %234 }
  0xa2   : > { %v240_v42 = vsel %vm982_vm0, %v237_v40, %v235_v41  ;;  %v239_v43 = vsel %vm982_vm0, %v235_v41, %v237_v40  ;;  %vm334_vm0 = vcmask 654336  }
  0xa3   : > { %621 = vmatpush.msk.msra.mxu0 %vm198_vm13, %v240_v42  ;;  %372 = vmatpush.msra.mxu1 %v239_v43 }
  0xa9   : > { %v226_v46 = vpop.permute.xlu0 %225 }
  0xaa   : > { %v229_v48 = vsel %vm227_vm14, %v226_v46, %v224_v44  ;;  %v228_v49 = vsel %vm227_vm14, %v224_v44, %v226_v46 }
  0xab   : > { %622 = vmatpush.msk.msra.mxu0 %vm866_vm12, %v229_v48  ;;  %630 = vmatpush.msk.msra.mxu1 %vm777_vm7, %v228_v49 }
  0xac   : > { %605 = vmatmul.msk.f32.vlgmr.msra.gmra.mxu0 %vm334_vm0, %v313_v47  ;;  %606 = vmatmul.msk.f32.vlgmr.msra.gmra.mxu1 %vm334_vm0, %v313_v47 }
 0x129   : > { %v355_v50 = vpop.f32.mrf.mxu0  ;;  %v375_v51 = vpop.f32.mrf.mxu1 }
 0x12a   : > { %v378_v52 = vmax.f32 %v355_v50, 0.0  ;;  %v379_v53 = vmax.f32 %v375_v51, 0.0 }
 0x12c   : > { %442 = vrot.lane.b32.xlu0 %v378_v52, %s672_s18  ;;  %452 = vrot.lane.b32.xlu1 %v378_v52, %s673_s19 }
 0x12d   : > { %454 = vrot.lane.b32.xlu2 %v379_v53, %s673_s19 }
 0x134   : > { %434 = vrot.lane.b32.xlu0 %v379_v53, %s674_s20  ;;  %444 = vrot.lane.b32.xlu1 %v379_v53, %s672_s18 }
 0x135   : > { %432 = vrot.lane.b32.xlu2 %v378_v52, %s674_s20 }
 0x13c   : > { %410 = vrot.lane.b32.xlu0 %v378_v52, %s676_s22  ;;  %422 = vrot.lane.b32.xlu1 %v378_v52, %s675_s21 }
 0x13d   : > { %424 = vrot.lane.b32.xlu2 %v379_v53, %s675_s21 }
 0x144   : > { %402 = vrot.lane.b32.xlu0 %v379_v53, %s677_s23  ;;  %412 = vrot.lane.b32.xlu1 %v379_v53, %s676_s22 }
 0x145   : > { %400 = vrot.lane.b32.xlu2 %v378_v52, %s677_s23 }
 0x14c   : > { %380 = vrot.lane.b32.xlu0 %v378_v52, %s679_s25  ;;  %390 = vrot.lane.b32.xlu1 %v378_v52, %s678_s24 }
 0x14d   : > { %392 = vrot.lane.b32.xlu2 %v379_v53, %s678_s24 }
 0x154   : > { %382 = vrot.lane.b32.xlu1 %v379_v53, %s679_s25 }
 0x187   : > { %v455_v54 = vpop.permute.xlu2 %454 }
 0x18f   : > { %v433_v59 = vpop.permute.xlu2 %432 }
 0x197   : > { %v425_v2 = vpop.permute.xlu2 %424 }
 0x19e   : > { %v443_v55 = vpop.permute.xlu0 %442  ;;  %v453_v56 = vpop.permute.xlu1 %452 }
 0x19f   : > { %v456_v57 = vsel %vm306_vm3, %v453_v56, %v455_v54  ;;  %v457_v58 = vsel %vm306_vm3, %v455_v54, %v453_v56  ;;  %v401_v8 = vpop.permute.xlu2 %400 }
 0x1a0   : > { %632 = vmatpush.msk.msra.mxu2 %vm764_vm4, %v456_v57  ;;  %640 = vmatpush.msk.msra.mxu3 %vm772_vm5, %v457_v58 }
 0x1a6   : > { %v435_v60 = vpop.permute.xlu0 %434  ;;  %v445_v61 = vpop.permute.xlu1 %444 }
 0x1a7   : > { %v446_v62 = vsel %vm295_vm6, %v443_v55, %v445_v61  ;;  %v447_v63 = vsel %vm295_vm6, %v445_v61, %v443_v55  ;;  %v436_v0 = vsel %vm284_vm8, %v433_v59, %v435_v60  ;;  %v437_v1 = vsel %vm284_vm8, %v435_v60, %v433_v59  ;;  %v393_v16 = vpop.permute.xlu2 %392 }
 0x1a8   : > { %498 = vmatpush.msra.mxu2 %v446_v62  ;;  %641 = vmatpush.msk.msra.mxu3 %vm201_vm1, %v447_v63  ;;  %vm999_vm1 = vcmp.lt.s32.totalorder %v751_v5, 1  ;;  %vm1003_vm6 = vcmp.lt.s32.totalorder %v751_v5, 16 }
 0x1a9   : > { %vm1000_vm3 = vmmov %vm999_vm1 }
 0x1aa   : > { %633 = vmatpush.msk.msra.mxu2 %vm794_vm9, %v436_v0  ;;  %642 = vmatpush.msk.msra.mxu3 %vm802_vm10, %v437_v1  ;;  %vm1004_vm8 = vmmov %vm1003_vm6 }
 0x1ae   : > { %v411_v3 = vpop.permute.xlu0 %410  ;;  %v423_v4 = vpop.permute.xlu1 %422 }
 0x1af   : > { %v426_v6 = vsel %vm273_vm11, %v423_v4, %v425_v2  ;;  %v427_v7 = vsel %vm273_vm11, %v425_v2, %v423_v4 }
 0x1b0   : > { %634 = vmatpush.msk.msra.mxu2 %vm764_vm4, %v426_v6  ;;  %643 = vmatpush.msk.msra.mxu3 %vm759_vm2, %v427_v7  ;;  %vm1001_vm4 = vcmp.lt.s32.totalorder %v751_v5, 15 }
 0x1b1   : > { %vm1002_vm5 = vmmov %vm1001_vm4 }
 0x1b2   : > { %501 = vmatpush.msra.mxu2 %v378_v52  ;;  %524 = vmatpush.msra.mxu3 %v379_v53 }
 0x1b6   : > { %v403_v9 = vpop.permute.xlu0 %402  ;;  %v413_v10 = vpop.permute.xlu1 %412 }
 0x1b7   : > { %v415_v11 = vsel %vm999_vm1, %v413_v10, %v411_v3  ;;  %v414_v12 = vsel %vm1000_vm3, %v411_v3, %v413_v10  ;;  %v405_v14 = vsel %vm1001_vm4, %v403_v9, %v401_v8  ;;  %v404_v15 = vsel %vm1002_vm5, %v401_v8, %v403_v9 }
 0x1b8   : > { %635 = vmatpush.msk.msra.mxu2 %vm794_vm9, %v415_v11  ;;  %644 = vmatpush.msk.msra.mxu3 %vm777_vm7, %v414_v12 }
 0x1ba   : > { %636 = vmatpush.msk.msra.mxu2 %vm838_vm15, %v405_v14  ;;  %645 = vmatpush.msk.msra.mxu3 %vm759_vm2, %v404_v15 }
 0x1be   : > { %v391_v17 = vpop.permute.xlu1 %390  ;;  %v381_v21 = vpop.permute.xlu0 %380 }
 0x1bf   : > { %v395_v19 = vsel %vm1003_vm6, %v393_v16, %v391_v17  ;;  %v394_v20 = vsel %vm1004_vm8, %v391_v17, %v393_v16 }
 0x1c0   : > { %637 = vmatpush.msk.msra.mxu2 %vm198_vm13, %v395_v19  ;;  %527 = vmatpush.msra.mxu3 %v394_v20 }
 0x1c6   : > { %v383_v22 = vpop.permute.xlu1 %382 }
 0x1c7   : > { %v385_v23 = vsel %vm227_vm14, %v383_v22, %v381_v21  ;;  %v384_v24 = vsel %vm227_vm14, %v381_v21, %v383_v22 }
 0x1c8   : > { %638 = vmatpush.msk.msra.mxu2 %vm866_vm12, %v385_v23  ;;  %646 = vmatpush.msk.msra.mxu3 %vm777_vm7, %v384_v24 }
 0x1c9   : > { %607 = vmatmul.msk.f32.vlgmr.msra.gmra.mxu2 %vm334_vm0, %v462_v13  ;;  %609 = vmatmul.msk.f32.vlgmr.msra.gmra.mxu3 %vm334_vm0, %v462_v13 }
 0x1d1   : > { %608 = vmatmul.msk.f32.gmra.mxu2 %vm334_vm0, %v463_v25  ;;  %610 = vmatmul.msk.f32.gmra.mxu3 %vm334_vm0, %v463_v25 }
 0x24c   : > { %v507_v5 = vpop.f32.mrf.mxu2  ;;  %v530_v18 = vpop.f32.mrf.mxu3 }
 0x24d   : > { %536 = vst [vmem:[%s170_s8] sm:$0xff] %v507_v5 }
 0x24e   : > { %537 = vst [vmem:[%s170_s8 + $0x8] sm:$0xff] %v530_v18 }
 0x254   : > { %v510_v26 = vpop.f32.mrf.mxu2  ;;  %v533_v27 = vpop.f32.mrf.mxu3 }
 0x255   : > { %538 = vst [vmem:[%s170_s8 + $0x10] sm:$0xff] %v510_v26 }
 0x256   : > { %539 = vst [vmem:[%s170_s8 + $0x18] sm:$0xff] %v533_v27 }
 0x257 PF: > { %s13_s12 = sadd.s32 1, %s670_s12  }
 0x258   : > { %p10_p4 = scmp.ge.s32.totalorder %s13_s12, 4  }
 0x25a   :  { %12 = sbr.rel (!%p10_p4) target bundleno = 1 (0x1), region = 62 }

</bundles_post_ra>
